<compile_context>
chip_gen: v6e
topology: v6e:2x2x1
jax: 0.10.0
libtpu: 0.0.40
codegen_flags: <defaults>
</compile_context>

<pallas_src>
import functools
import math

import jax
import jax.numpy as jnp
from jax import lax
from jax.experimental import pallas as pl
from jax.experimental.pallas import tpu as pltpu


# ------------------------------------------------------------------
# small helpers
# ------------------------------------------------------------------

def _triple(v):
    return tuple(v) if isinstance(v, (tuple, list)) else (v, v, v)


def _round_up(x, m):
    return ((x + m - 1) // m) * m


def _pick_group(spatial_dims, c, target=2048):
    """Largest suffix product of spatial_dims such that group*c <= target."""
    group = 1
    for d in reversed(spatial_dims):
        if group * d * c <= target:
            group *= d
        else:
            break
    return group


def _pick_tm(M, K, C, budget=8 * 1024 * 1024):
    """Row-tile so double-buffered x block (bf16) + out block (f32) fit budget."""
    per_row = 2 * (K * 2) + 2 * (C * 4)
    tm = max(8, min(512, budget // max(per_row, 1)))
    return _round_up(min(tm, M), 8)


_VMEM_LIMIT = 32 * 1024 * 1024  # explicit scoped-VMEM budget (safe on v5e/v6e/v7x)


# ------------------------------------------------------------------
# Pallas kernels
# ------------------------------------------------------------------

def _gemm_affine_kernel(x_ref, w_ref, scale_ref, shift_ref, o_ref, *, relu):
    # (tm, K)bf16 @ (K, C)bf16 on the MXU, f32 accumulate, fused per-channel
    # affine (+ReLU) epilogue -> output written once.
    acc = jnp.dot(x_ref[...], w_ref[...], preferred_element_type=jnp.float32)
    out = acc * scale_ref[...] + shift_ref[...]
    if relu:
        out = jnp.maximum(out, 0.0)
    o_ref[...] = out.astype(o_ref.dtype)


def gemm_affine(x2d, w2d, scale, shift, relu):
    """(M, K)bf16 @ (K, C)bf16 -> f32, with fused scale/shift(+ReLU)."""
    M, K = x2d.shape
    _, C = w2d.shape
    tm = _pick_tm(M, K, C)
    return pl.pallas_call(
        functools.partial(_gemm_affine_kernel, relu=bool(relu)),
        out_shape=jax.ShapeDtypeStruct((M, C), jnp.float32),
        grid_spec=pltpu.PrefetchScalarGridSpec(
            num_scalar_prefetch=0,
            grid=(pl.cdiv(M, tm),),
            in_specs=[pl.BlockSpec((tm, K), lambda i: (i, 0)),
                      pl.BlockSpec((K, C), lambda i: (0, 0)),
                      pl.BlockSpec((1, C), lambda i: (0, 0)),
                      pl.BlockSpec((1, C), lambda i: (0, 0))],
            out_specs=pl.BlockSpec((tm, C), lambda i: (i, 0))),
        compiler_params=pltpu.CompilerParams(
            dimension_semantics=("parallel",),
            vmem_limit_bytes=_VMEM_LIMIT),
    )(x2d, w2d,
      scale.reshape(1, C).astype(jnp.float32),
      shift.reshape(1, C).astype(jnp.float32))


def _gemm_bias_stats_kernel(x_ref, w_ref, bias_ref, y_ref, sum_ref, sq_ref,
                            *, m_total, tm, need_mask):
    # GEMM + bias, plus per-channel sum / sum-of-squares accumulated across the
    # M grid axis (accumulator outputs with constant index_map -> resident).
    @pl.when(pl.program_id(0) == 0)
    def _():
        sum_ref[...] = jnp.zeros_like(sum_ref)
        sq_ref[...] = jnp.zeros_like(sq_ref)

    y = jnp.dot(x_ref[...], w_ref[...], preferred_element_type=jnp.float32)
    y = y + bias_ref[...]
    y_ref[...] = y

    if need_mask:
        # Mask rows beyond the logical end (partial last block reads junk).
        row = pl.program_id(0) * tm + lax.broadcasted_iota(jnp.int32, y.shape, 0)
        ym = jnp.where(row < m_total, y, 0.0)
    else:
        ym = y
    sum_ref[...] += jnp.sum(ym, axis=0, keepdims=True)
    sq_ref[...] += jnp.sum(ym * ym, axis=0, keepdims=True)


def gemm_bias_stats(x2d, w2d, bias):
    """Fused (M,K)@(K,C)+bias producing y (f32) and per-channel sum / sum-sq."""
    M, K = x2d.shape
    _, C = w2d.shape
    tm = _pick_tm(M, K, C)
    y, s, sq = pl.pallas_call(
        functools.partial(_gemm_bias_stats_kernel, m_total=M, tm=tm,
                          need_mask=(M % tm != 0)),
        out_shape=(jax.ShapeDtypeStruct((M, C), jnp.float32),
                   jax.ShapeDtypeStruct((1, C), jnp.float32),
                   jax.ShapeDtypeStruct((1, C), jnp.float32)),
        grid_spec=pltpu.PrefetchScalarGridSpec(
            num_scalar_prefetch=0,
            grid=(pl.cdiv(M, tm),),
            in_specs=[pl.BlockSpec((tm, K), lambda i: (i, 0)),
                      pl.BlockSpec((K, C), lambda i: (0, 0)),
                      pl.BlockSpec((1, C), lambda i: (0, 0))],
            out_specs=(pl.BlockSpec((tm, C), lambda i: (i, 0)),
                       pl.BlockSpec((1, C), lambda i: (0, 0)),
                       pl.BlockSpec((1, C), lambda i: (0, 0)))),
        compiler_params=pltpu.CompilerParams(
            dimension_semantics=("arbitrary",),   # stats accumulate across M
            vmem_limit_bytes=_VMEM_LIMIT),
    )(x2d, w2d, bias.reshape(1, C).astype(jnp.float32))
    return y, s[0], sq[0]


def _affine_kernel(y_ref, scale_ref, shift_ref, o_ref, *, relu):
    out = y_ref[...] * scale_ref[...] + shift_ref[...]
    if relu:
        out = jnp.maximum(out, 0.0)
    o_ref[...] = out.astype(o_ref.dtype)


def affine_relu_lanedense(y2d, scale, shift, relu, group, tr=256):
    """Per-channel affine (+ReLU) over (M, C), viewed lane-densely as
    (M/group, group*C) so vector stores are not masked down to C/128 lanes."""
    M, C = y2d.shape
    assert M % group == 0
    R, L = M // group, group * C
    yr = y2d.reshape(R, L)
    scale_t = jnp.tile(scale.astype(jnp.float32), group).reshape(1, L)
    shift_t = jnp.tile(shift.astype(jnp.float32), group).reshape(1, L)
    tr = R if R <= tr else tr            # full-dim block if R is small
    out = pl.pallas_call(
        functools.partial(_affine_kernel, relu=bool(relu)),
        out_shape=jax.ShapeDtypeStruct((R, L), jnp.float32),
        grid_spec=pltpu.PrefetchScalarGridSpec(
            num_scalar_prefetch=0,
            grid=(pl.cdiv(R, tr),),
            in_specs=[pl.BlockSpec((tr, L), lambda i: (i, 0)),
                      pl.BlockSpec((1, L), lambda i: (0, 0)),
                      pl.BlockSpec((1, L), lambda i: (0, 0))],
            out_specs=pl.BlockSpec((tr, L), lambda i: (i, 0))),
        compiler_params=pltpu.CompilerParams(
            dimension_semantics=("parallel",),
            vmem_limit_bytes=_VMEM_LIMIT),
    )(yr, scale_t, shift_t)
    return out.reshape(M, C)


# ------------------------------------------------------------------
# Module: Conv3d -> BatchNorm3d -> optional ReLU
# ------------------------------------------------------------------

class Conv3dPallas:
    def __init__(self, key, in_channels, out_channels, k, s, p,
                 batch_norm=True, eps=1e-5):
        self.k, self.s, self.p = _triple(k), _triple(s), _triple(p)
        self.in_channels, self.out_channels = in_channels, out_channels
        self.batch_norm = batch_norm
        self.eps = eps

        kw, kb, kg = jax.random.split(key, 3)
        kD, kH, kW = self.k
        # Conv3d weight layout: (Cout, Cin, kD, kH, kW); xavier_normal-like init.
        fan = (in_channels + out_channels) * kD * kH * kW
        std = math.sqrt(2.0 / fan)
        self.weight = std * jax.random.normal(
            kw, (out_channels, in_channels, kD, kH, kW), jnp.float32)
        self.bias = jax.random.normal(kb, (out_channels,), jnp.float32)
        if batch_norm:
            self.gamma = 1.0 + 0.02 * jax.random.normal(
                kg, (out_channels,), jnp.float32)
            self.beta = jnp.zeros((out_channels,), jnp.float32)
            self.running_mean = jnp.zeros((out_channels,), jnp.float32)
            self.running_var = jnp.ones((out_channels,), jnp.float32)
        # TODO(synk): BatchNorm running-stat (momentum) updates are not
        # materialized; they do not affect this forward pass.

    def __call__(self, inference, relu, x):
        N, Cin, Din, Hin, Win = x.shape
        assert Cin == self.in_channels
        kD, kH, kW = self.k
        sD, sH, sW = self.s
        pD, pH, pW = self.p
        Cout = self.out_channels
        Dout = (Din + 2 * pD - kD) // sD + 1
        Hout = (Hin + 2 * pH - kH) // sH + 1
        Wout = (Win + 2 * pW - kW) // sW + 1
        K = Cin * kD * kH * kW
        M = N * Dout * Hout * Wout

        # im2col: (N, Dout, Hout, Wout, Cin*k^3), channel-major feature order,
        # produced channel-last directly (no extra transpose pass), in bf16.
        # TODO(synk): patch extraction runs in XLA; fusing it into the Pallas
        # GEMM would need halo-tiled spatial BlockSpecs.
        patches = lax.conv_general_dilated_patches(
            x.astype(jnp.bfloat16), (kD, kH, kW), (sD, sH, sW),
            padding=[(pD, pD), (pH, pH), (pW, pW)],
            dimension_numbers=('NCDHW', 'OIDHW', 'NDHWC'))
        x2d = patches.reshape(M, K)                                  # bf16
        w2d = jnp.transpose(
            self.weight.reshape(Cout, K)).astype(jnp.bfloat16)       # (K, Cout)

        if self.batch_norm and not inference:
            # Training BN: GEMM + bias with fused per-channel sum/sum-sq epilogue,
            # then a lane-dense affine+ReLU second pass.
            y2d, ssum, ssq = gemm_bias_stats(x2d, w2d, self.bias)
            cnt = float(M)
            mean = ssum / cnt
            var = jnp.maximum(ssq / cnt - mean * mean, 0.0)   # clamp cancellation
            inv = lax.rsqrt(var + self.eps)
            scale = self.gamma * inv
            shift = self.beta - mean * scale
            group = _pick_group((Dout, Hout, Wout), Cout)
            out2d = affine_relu_lanedense(y2d, scale, shift, relu, group)
        else:
            # Inference BN (running stats) or no BN: fold everything into the
            # GEMM epilogue -> single pass over the output.
            if self.batch_norm:
                inv = lax.rsqrt(self.running_var + self.eps)
                scale = self.gamma * inv
                shift = self.beta + (self.bias - self.running_mean) * scale
            else:
                scale = jnp.ones((Cout,), jnp.float32)
                shift = self.bias
            out2d = gemm_affine(x2d, w2d, scale, shift, relu)

        out = out2d.reshape(N, Dout, Hout, Wout, Cout)
        # TODO(synk): the final NDHWC->NCDHW permute runs in XLA; folding it into
        # the kernel's out_spec would need a strided output layout.
        return jnp.transpose(out, (0, 4, 1, 2, 3))


# ------------------------------------------------------------------
# Pure-JAX reference (independent of the Pallas path) for verification
# ------------------------------------------------------------------

def reference_forward(m, inference, relu, x):
    # Use the same bf16-rounded operands the Pallas path feeds the MXU.
    xf = x.astype(jnp.bfloat16).astype(jnp.float32)
    wf = m.weight.astype(jnp.bfloat16).astype(jnp.float32)
    y = lax.conv_general_dilated(
        xf, wf, window_strides=m.s,
        padding=[(m.p[0], m.p[0]), (m.p[1], m.p[1]), (m.p[2], m.p[2])],
        dimension_numbers=('NCDHW', 'OIDHW', 'NCDHW'))
    y = y + m.bias.reshape(1, -1, 1, 1, 1)
    if m.batch_norm:
        if inference:
            mean, var = m.running_mean, m.running_var
        else:
            mean = jnp.mean(y, axis=(0, 2, 3, 4))
            var = jnp.var(y, axis=(0, 2, 3, 4))
        y = (y - mean.reshape(1, -1, 1, 1, 1)) * \
            lax.rsqrt(var + m.eps).reshape(1, -1, 1, 1, 1)
        y = y * m.gamma.reshape(1, -1, 1, 1, 1) + m.beta.reshape(1, -1, 1, 1, 1)
    return jnp.maximum(y, 0.0) if relu else y


if __name__ == "__main__":
    key = jax.random.PRNGKey(0)
    k_param, k_x = jax.random.split(key)

    N, Cin, Cout = 2, 4, 8
    D = H = W = 16
    module = Conv3dPallas(k_param, Cin, Cout, k=3, s=2, p=1, batch_norm=True)
    x = jax.random.normal(k_x, (N, Cin, D, H, W), jnp.float32)

    # Training-mode BN + ReLU (GEMM+stats kernel, then lane-dense affine kernel).
    out_tr = jax.block_until_ready(module(inference=False, relu=True, x=x))
    ref_tr = reference_forward(module, False, True, x)
    assert out_tr.shape == ref_tr.shape, (out_tr.shape, ref_tr.shape)
    assert jnp.allclose(out_tr, ref_tr, atol=2e-3, rtol=2e-3), \
        float(jnp.max(jnp.abs(out_tr - ref_tr)))

    # Inference-mode BN, no ReLU (single fused GEMM + affine epilogue kernel).
    out_inf = jax.block_until_ready(module(inference=True, relu=False, x=x))
    ref_inf = reference_forward(module, True, False, x)
    assert out_inf.shape == ref_inf.shape, (out_inf.shape, ref_inf.shape)
    assert jnp.allclose(out_inf, ref_inf, atol=2e-3, rtol=2e-3), \
        float(jnp.max(jnp.abs(out_inf - ref_inf)))

    print("KERNEL_OK")
</pallas_src>

<mosaic_0001>
module attributes {stable_mosaic.version = 11 : i64} {
  func.func @_gemm_bias_stats_kernel(%arg0: i32, %arg1: memref<512x108xbf16, #tpu.memory_space<vmem>>, %arg2: memref<108x8xbf16, #tpu.memory_space<vmem>>, %arg3: memref<1x8xf32, #tpu.memory_space<vmem>>, %arg4: memref<512x8xf32, #tpu.memory_space<vmem>>, %arg5: memref<1x8xf32, #tpu.memory_space<vmem>>, %arg6: memref<1x8xf32, #tpu.memory_space<vmem>>) attributes {dimension_semantics = [#tpu.dimension_semantics<arbitrary>], iteration_bounds = array<i64: 2>, scalar_prefetch = 0 : i64, scratch_operands = 0 : i64, tpu.core_type = #tpu.core_type<tc>, window_params = [{transform_indices = @transform_0, window_bounds = array<i64: 512, 108>}, {pipeline_mode = #tpu.pipeline_mode<synchronous>, transform_indices = @transform_1, window_bounds = array<i64: 108, 8>}, {pipeline_mode = #tpu.pipeline_mode<synchronous>, transform_indices = @transform_2, window_bounds = array<i64: 1, 8>}, {transform_indices = @transform_3, window_bounds = array<i64: 512, 8>}, {pipeline_mode = #tpu.pipeline_mode<synchronous>, transform_indices = @transform_4, window_bounds = array<i64: 1, 8>}, {pipeline_mode = #tpu.pipeline_mode<synchronous>, transform_indices = @transform_5, window_bounds = array<i64: 1, 8>}]} {
    %c0_i32 = arith.constant 0 : i32
    %0 = arith.cmpi eq, %arg0, %c0_i32 : i32
    %1 = arith.extui %0 : i1 to i32
    %c0_i32_0 = arith.constant 0 : i32
    %2 = arith.cmpi ne, %1, %c0_i32_0 : i32
    scf.if %2 {
      %cst_18 = arith.constant 0.000000e+00 : f32
      %21 = vector.broadcast %cst_18 : f32 to vector<1x8xf32>
      %c0_19 = arith.constant 0 : index
      %c0_20 = arith.constant 0 : index
      %22 = vector.load %arg5[%c0_19, %c0_20] : memref<1x8xf32, #tpu.memory_space<vmem>>, vector<1x8xf32>
      tpu.vector_store %arg5[%c0_19, %c0_20], %21 {strides = array<i32>} : memref<1x8xf32, #tpu.memory_space<vmem>>, vector<1x8xf32>,
      %cst_21 = arith.constant 0.000000e+00 : f32
      %23 = vector.broadcast %cst_21 : f32 to vector<1x8xf32>
      %c0_22 = arith.constant 0 : index
      %c0_23 = arith.constant 0 : index
      %24 = vector.load %arg6[%c0_22, %c0_23] : memref<1x8xf32, #tpu.memory_space<vmem>>, vector<1x8xf32>
      tpu.vector_store %arg6[%c0_22, %c0_23], %23 {strides = array<i32>} : memref<1x8xf32, #tpu.memory_space<vmem>>, vector<1x8xf32>,
    } else {
    }
    %c0 = arith.constant 0 : index
    %c0_1 = arith.constant 0 : index
    %3 = vector.load %arg1[%c0, %c0_1] : memref<512x108xbf16, #tpu.memory_space<vmem>>, vector<512x108xbf16>
    %c0_2 = arith.constant 0 : index
    %c0_3 = arith.constant 0 : index
    %4 = vector.load %arg2[%c0_2, %c0_3] : memref<108x8xbf16, #tpu.memory_space<vmem>>, vector<108x8xbf16>
    %cst = arith.constant dense<0.000000e+00> : vector<512x8xf32>
    %5 = tpu.matmul %3, %4, %cst {dimension_numbers = #tpu.dot_dimension_numbers<[1], [0], [0], [1], [0, 0, 1, 1], [], []>} : vector<512x108xbf16>, vector<108x8xbf16>, vector<512x8xf32> -> vector<512x8xf32>
    %c0_4 = arith.constant 0 : index
    %c0_5 = arith.constant 0 : index
    %6 = vector.load %arg3[%c0_4, %c0_5] : memref<1x8xf32, #tpu.memory_space<vmem>>, vector<1x8xf32>
    %7 = vector.broadcast %6 : vector<1x8xf32> to vector<512x8xf32>
    %8 = arith.addf %5, %7 : vector<512x8xf32>
    %c0_6 = arith.constant 0 : index
    %c0_7 = arith.constant 0 : index
    %9 = vector.load %arg4[%c0_6, %c0_7] : memref<512x8xf32, #tpu.memory_space<vmem>>, vector<512x8xf32>
    tpu.vector_store %arg4[%c0_6, %c0_7], %8 {strides = array<i32>} : memref<512x8xf32, #tpu.memory_space<vmem>>, vector<512x8xf32>,
    %c0_8 = arith.constant 0 : index
    %c0_9 = arith.constant 0 : index
    %10 = vector.load %arg5[%c0_8, %c0_9] : memref<1x8xf32, #tpu.memory_space<vmem>>, vector<1x8xf32>
    %cst_10 = arith.constant dense<0.000000e+00> : vector<8xf32>
    %11 = vector.multi_reduction <add>, %8, %cst_10 [0] : vector<512x8xf32> to vector<8xf32>
    %12 = vector.shape_cast %11 : vector<8xf32> to vector<1x8xf32>
    %13 = arith.addf %10, %12 : vector<1x8xf32>
    %c0_11 = arith.constant 0 : index
    %c0_12 = arith.constant 0 : index
    %14 = vector.load %arg5[%c0_11, %c0_12] : memref<1x8xf32, #tpu.memory_space<vmem>>, vector<1x8xf32>
    tpu.vector_store %arg5[%c0_11, %c0_12], %13 {strides = array<i32>} : memref<1x8xf32, #tpu.memory_space<vmem>>, vector<1x8xf32>,
    %c0_13 = arith.constant 0 : index
    %c0_14 = arith.constant 0 : index
    %15 = vector.load %arg6[%c0_13, %c0_14] : memref<1x8xf32, #tpu.memory_space<vmem>>, vector<1x8xf32>
    %16 = arith.mulf %8, %8 : vector<512x8xf32>
    %cst_15 = arith.constant dense<0.000000e+00> : vector<8xf32>
    %17 = vector.multi_reduction <add>, %16, %cst_15 [0] : vector<512x8xf32> to vector<8xf32>
    %18 = vector.shape_cast %17 : vector<8xf32> to vector<1x8xf32>
    %19 = arith.addf %15, %18 : vector<1x8xf32>
    %c0_16 = arith.constant 0 : index
    %c0_17 = arith.constant 0 : index
    %20 = vector.load %arg6[%c0_16, %c0_17] : memref<1x8xf32, #tpu.memory_space<vmem>>, vector<1x8xf32>
    tpu.vector_store %arg6[%c0_16, %c0_17], %19 {strides = array<i32>} : memref<1x8xf32, #tpu.memory_space<vmem>>, vector<1x8xf32>,
    return
  }
  func.func @transform_0(%arg0: i32) -> (i32, i32) {
    %c0_i32 = arith.constant 0 : i32
    %c0_i32_0 = arith.constant 0 : i32
    return %arg0, %c0_i32 : i32, i32
  }
  func.func @transform_1(%arg0: i32) -> (i32, i32) {
    %c0_i32 = arith.constant 0 : i32
    %c0_i32_0 = arith.constant 0 : i32
    %c0_i32_1 = arith.constant 0 : i32
    return %c0_i32, %c0_i32_0 : i32, i32
  }
  func.func @transform_2(%arg0: i32) -> (i32, i32) {
    %c0_i32 = arith.constant 0 : i32
    %c0_i32_0 = arith.constant 0 : i32
    %c0_i32_1 = arith.constant 0 : i32
    return %c0_i32, %c0_i32_0 : i32, i32
  }
  func.func @transform_3(%arg0: i32) -> (i32, i32) {
    %c0_i32 = arith.constant 0 : i32
    %c0_i32_0 = arith.constant 0 : i32
    return %arg0, %c0_i32 : i32, i32
  }
  func.func @transform_4(%arg0: i32) -> (i32, i32) {
    %c0_i32 = arith.constant 0 : i32
    %c0_i32_0 = arith.constant 0 : i32
    %c0_i32_1 = arith.constant 0 : i32
    return %c0_i32, %c0_i32_0 : i32, i32
  }
  func.func @transform_5(%arg0: i32) -> (i32, i32) {
    %c0_i32 = arith.constant 0 : i32
    %c0_i32_0 = arith.constant 0 : i32
    %c0_i32_1 = arith.constant 0 : i32
    return %c0_i32, %c0_i32_0 : i32, i32
  }
}

</mosaic_0001>

<bundles_post_ra>
// kernel: tpu_custom_call.1
= control target key start
LH: loop header
LB: loop body
LE: loop exit
PB: predicated region body
PF: predicated region fallthrough
CT: control target
= control target key end

     0   :  { %11 = vsyncpa [#allocation3], 0  ;;  %s2499_s0 = inlined_call_operand.vmem [shape: bf16[1024,108], index: 0, kind: input, shape index: {}]   ;;  %s2500_s1 = inlined_call_operand.vmem [shape: bf16[108,8], index: 1, kind: input, shape index: {}]   ;;  %s2501_s2 = inlined_call_operand.vmem [shape: f32[1,8], index: 2, kind: input, shape index: {}]   ;;  %s2502_s3 = inlined_call_operand.vmem [shape: f32[1024,8], index: 3, kind: output, shape index: {0}]   ;;  %s2503_s4 = inlined_call_operand.hbm [shape: f32[1,8], index: 4, kind: output, shape index: {1}]   ;;  %s2504_s5 = inlined_call_operand.hbm [shape: f32[1,8], index: 5, kind: output, shape index: {2}]  }
   0x1   :  { %12 = vsyncpa [#allocation5], 0  ;;  %s1793_s18 = smov 0  }
   0x2 LB: > { %s1799_s19 = sadd.s32 4294967295, %s1758_s18   ;;  %p1417_p0 = scmp.ge.s32.totalorder %s1758_s18, 1  ;;  %s1758_s18 = sphi %s1793_s18, %s18_s18  }
   0x3   : > { %p185_p1 = scmp.lt.s32.totalorder %s1758_s18, 3 }
   0x5   : > { %p186_p2 = pnand %p1417_p0, %p185_p1 }
   0x6   : > { %s1418_s20 = sshll.u32 (!%p186_p2), %s1799_s19, 6  ;;  %p1422_p4 = scmp.ne.s32.totalorder (!%p186_p2), %s1799_s19, 0 }
   0x7   : > { %189 = sbr.rel (%p186_p2) target bundleno = 408 (0x198), region = 32  ;;  %p214_p3 = scmp.lt.s32.totalorder (!%p186_p2), %s1418_s20, 127 }
   0xc   : > { %s2506_s20 = smov (!%p214_p3, %s1418_s20), 127  ;;  %229 = sbr.rel (%p1422_p4) target bundleno = 19 (0x13), region = 36 }
   0xd   : > { %s1419_s21 = sshll.u32 %s2506_s20, 2  ;;  %s1421_s22 = sshll.u32 %s2506_s20, 3 }
   0xe   : > { %s1807_s25 = scalar_lea.vmem %s2499_s0, %s1419_s21  ;;  %s1812_s28 = scalar_lea.vmem %s2502_s3, %s1421_s22 }
  0x11   : > { %vm230_vm0 = vcmask 57344   ;;  %v1760_v0 = vmov 0.0  }
  0x12   : > { %231 = vst.msk [vmem:[#allocation2] sm:$0x1] %vm230_vm0, %v1760_v0  ;;  %232 = vst.msk [vmem:[#allocation4] sm:$0x1] %vm230_vm0, %v1760_v0 }
  0x13 PF: > { %v1657_v1 = vld [vmem:[%s2500_s1 + $0x30] sm:$0x3f]   ;;  %vm616_vm1 = vcmask 1045504   ;;  %v1658_v2 = vld [vmem:[%s2500_s1 + $0x28] sm:$0xff]   ;;  %v1659_v4 = vld [vmem:[%s2500_s1 + $0x20] sm:$0xff]   ;;  %vm519_vm2 = vcmask 883712  }
  0x14   : > { %1632 = vmatprep.subr.msk.bf16.mxu0 %vm616_vm1, %v1657_v1  ;;  %v618_v3 = vsel %vm616_vm1, %v1657_v1, 0  ;;  %1633 = vmatprep.subr.msk.bf16.mxu1 %vm616_vm1, %v1657_v1  ;;  %v1664_v5 = vld [vmem:[%s1807_s25] sm:$0xff]   ;;  %v1660_v6 = vld [vmem:[%s2500_s1 + $0x18] sm:$0xff]   ;;  %v1661_v7 = vld [vmem:[%s2500_s1 + $0x10] sm:$0xff]   ;;  %vm909_vm3 = vcmask 64512   ;;  %s1761_s22 = smov [#allocation2]  }
  0x15   : > { %1541 = vmatpush3.bf16.msra.mxu0 %v618_v3  ;;  %1625 = vmatpush3.bf16.msra.mxu1 %v618_v3  ;;  %v1662_v8 = vld [vmem:[%s2500_s1 + $0x8] sm:$0xff]   ;;  %v1663_v9 = vld [vmem:[%s2500_s1] sm:$0xff]   ;;  %v1666_v12 = vld [vmem:[%s1807_s25 + $0x10] sm:$0xff]   ;;  %s1327_s23 = sshll.u32 %s1761_s22, 4  ;;  %vm1109_vm4 = vcmask 57344   ;;  %p1642_p5 = scmp.eq.s32.totalorder %s1799_s19, 1  ;;  %s1328_s23 = int_to_ptr.vmem [resolvable:$true] %s1327_s23 }
  0x16   : > { %1542 = vmatprep.subr.bf16.mxu0 %v1658_v2  ;;  %1619 = vmatprep.subr.bf16.mxu1 %v1658_v2  ;;  %v1680_v10 = vld [vmem:[%s1807_s25 + $0x80] sm:$0xff]   ;;  %v1665_v11 = vld [vmem:[%s1807_s25 + $0x8] sm:$0xff]   ;;  %v1682_v14 = vld [vmem:[%s1807_s25 + $0x90] sm:$0xff]   ;;  %s1762_s24 = smov [#allocation4]   ;;  %s1696_s26 = scalar_lea.vmem %s1328_s23, 16 }
  0x17   : > { %1554 = vmatprep.mubr.msk.bf16.mxu0 %vm519_vm2, %v1664_v5  ;;  %1586 = vmatprep.mubr.msk.bf16.mxu1 %vm519_vm2, %v1680_v10  ;;  %v1681_v13 = vld [vmem:[%s1807_s25 + $0x88] sm:$0xff]   ;;  %v1667_v15 = vld [vmem:[%s1807_s25 + $0x18] sm:$0xff]   ;;  %v1668_v16 = vld [vmem:[%s1807_s25 + $0x20] sm:$0xff]   ;;  %p1697_p6 = scmp.ne.s32.totalorder %s1328_s23, %s1696_s26  ;;  %s1702_s27 = scalar_lea.vmem %s1328_s23, 32 }
  0x18   : > { %v1683_v17 = vld [vmem:[%s1807_s25 + $0x98] sm:$0xff]   ;;  %v1684_v18 = vld [vmem:[%s1807_s25 + $0xa0] sm:$0xff]   ;;  %v1669_v19 = vld [vmem:[%s1807_s25 + $0x28] sm:$0xff]   ;;  %p1703_p9 = scmp.lt.s32.totalorder %s1328_s23, %s1328_s23  ;;  %p1704_p10 = scmp.lt.s32.totalorder %s1702_s27, %s1696_s26 }
  0x19   : > { %1543 = vmatpush3.bf16.msra.mxu0 %v1658_v2  ;;  %1626 = vmatpush3.bf16.msra.mxu1 %v1658_v2  ;;  %v1685_v20 = vld [vmem:[%s1807_s25 + $0xa8] sm:$0xff]   ;;  %v1670_v21 = vld [vmem:[%s1807_s25 + $0x30] sm:$0xff]   ;;  %v1671_v23 = vld [vmem:[%s1807_s25 + $0x38] sm:$0xff]   ;;  %p1698_p7 = pnand %p1697_p6, %p1642_p5 }
  0x1a   : > { %1544 = vmatprep.subr.bf16.mxu0 %v1659_v4  ;;  %1620 = vmatprep.subr.bf16.mxu1 %v1659_v4  ;;  %v1686_v22 = vld [vmem:[%s1807_s25 + $0xb0] sm:$0xff]   ;;  %v1687_v24 = vld [vmem:[%s1807_s25 + $0xb8] sm:$0xff]   ;;  %v1672_v25 = vld [vmem:[%s1807_s25 + $0x40] sm:$0xff]   ;;  %p1705_p11 = por %p1704_p10, %p1703_p9 }
  0x1b   : > { %v1688_v26 = vld [vmem:[%s1807_s25 + $0xc0] sm:$0xff]   ;;  %v1673_v27 = vld [vmem:[%s1807_s25 + $0x48] sm:$0xff]   ;;  %v1674_v29 = vld [vmem:[%s1807_s25 + $0x50] sm:$0xff]   ;;  %p1699_p8 = pneg %p1698_p7 }
  0x1c   : > { %v1689_v28 = vld [vmem:[%s1807_s25 + $0xc8] sm:$0xff]   ;;  %v1690_v30 = vld [vmem:[%s1807_s25 + $0xd0] sm:$0xff]   ;;  %v1675_v31 = vld [vmem:[%s1807_s25 + $0x58] sm:$0xff]  }
  0x1d   : > { %1545 = vmatpush3.bf16.msra.mxu0 %v1659_v4  ;;  %1627 = vmatpush3.bf16.msra.mxu1 %v1659_v4  ;;  %v1691_v32 = vld [vmem:[%s1807_s25 + $0xd8] sm:$0xff]   ;;  %v1676_v33 = vld [vmem:[%s1807_s25 + $0x60] sm:$0xff]   ;;  %v1677_v35 = vld [vmem:[%s1807_s25 + $0x68] sm:$0xff]   ;;  %p1706_p12 = pnand %p1705_p11, %p1699_p8 }
  0x1e   : > { %1546 = vmatprep.subr.bf16.mxu0 %v1660_v6  ;;  %1621 = vmatprep.subr.bf16.mxu1 %v1660_v6  ;;  %v1692_v34 = vld [vmem:[%s1807_s25 + $0xe0] sm:$0xff]   ;;  %v1693_v36 = vld [vmem:[%s1807_s25 + $0xe8] sm:$0xff]   ;;  %v1678_v37 = vld [vmem:[%s1807_s25 + $0x70] sm:$0xff]  }
  0x1f   : > { %v1694_v38 = vld [vmem:[%s1807_s25 + $0xf0] sm:$0xff]   ;;  %v1679_v39 = vld [vmem:[%s1807_s25 + $0x78] sm:$0xff]   ;;  %v1903_v41 = vld [vmem:[%s2501_s2] ss:$0 sm:$0xff] }
  0x20   : > { %v1695_v40 = vld [vmem:[%s1807_s25 + $0xf8] sm:$0xff]   ;;  %s1338_s25 = sshll.u32 %s1762_s24, 4  ;;  %s1339_s25 = int_to_ptr.vmem [resolvable:$true] %s1338_s25 }
  0x21   : > { %1547 = vmatpush3.bf16.msra.mxu0 %v1660_v6  ;;  %1628 = vmatpush3.bf16.msra.mxu1 %v1660_v6 }
  0x22   : > { %1548 = vmatprep.subr.bf16.mxu0 %v1661_v7  ;;  %1622 = vmatprep.subr.bf16.mxu1 %v1661_v7 }
  0x25   : > { %1549 = vmatpush3.bf16.msra.mxu0 %v1661_v7  ;;  %1629 = vmatpush3.bf16.msra.mxu1 %v1661_v7 }
  0x26   : > { %1550 = vmatprep.subr.bf16.mxu0 %v1662_v8  ;;  %1623 = vmatprep.subr.bf16.mxu1 %v1662_v8 }
  0x29   : > { %1551 = vmatpush3.bf16.msra.mxu0 %v1662_v8  ;;  %1630 = vmatpush3.bf16.msra.mxu1 %v1662_v8 }
  0x2a   : > { %1552 = vmatprep.subr.bf16.mxu0 %v1663_v9  ;;  %1624 = vmatprep.subr.bf16.mxu1 %v1663_v9 }
  0x2d   : > { %1553 = vmatpush3.bf16.msra.mxu0 %v1663_v9  ;;  %1631 = vmatpush3.bf16.msra.mxu1 %v1663_v9 }
  0x30   : > { %1555 = vmatmul.mubr.msk.bf16.vlgmr.msra.gmra.mxu0 %vm519_vm2, %v1665_v11  ;;  %1587 = vmatmul.mubr.msk.bf16.vlgmr.msra.gmra.mxu1 %vm519_vm2, %v1681_v13 }
  0x31   : > { %1558 = vmatprep.mubr.msk.bf16.mxu0 %vm519_vm2, %v1666_v12  ;;  %1590 = vmatprep.mubr.msk.bf16.mxu1 %vm519_vm2, %v1682_v14 }
  0x38   : > { %1559 = vmatmul.mubr.msk.bf16.gmra.mxu0 %vm519_vm2, %v1667_v15  ;;  %1591 = vmatmul.mubr.msk.bf16.gmra.mxu1 %vm519_vm2, %v1683_v17 }
  0x39   : > { %1562 = vmatprep.mubr.msk.bf16.mxu0 %vm519_vm2, %v1668_v16  ;;  %1594 = vmatprep.mubr.msk.bf16.mxu1 %vm519_vm2, %v1684_v18 }
  0x40   : > { %1563 = vmatmul.mubr.msk.bf16.gmra.mxu0 %vm519_vm2, %v1669_v19  ;;  %1595 = vmatmul.mubr.msk.bf16.gmra.mxu1 %vm519_vm2, %v1685_v20 }
  0x41   : > { %1566 = vmatprep.mubr.msk.bf16.mxu0 %vm519_vm2, %v1670_v21  ;;  %1598 = vmatprep.mubr.msk.bf16.mxu1 %vm519_vm2, %v1686_v22 }
  0x48   : > { %1567 = vmatmul.mubr.msk.bf16.gmra.mxu0 %vm519_vm2, %v1671_v23  ;;  %1599 = vmatmul.mubr.msk.bf16.gmra.mxu1 %vm519_vm2, %v1687_v24 }
  0x49   : > { %1570 = vmatprep.mubr.msk.bf16.mxu0 %vm519_vm2, %v1672_v25  ;;  %1602 = vmatprep.mubr.msk.bf16.mxu1 %vm519_vm2, %v1688_v26 }
  0x50   : > { %1571 = vmatmul.mubr.msk.bf16.gmra.mxu0 %vm519_vm2, %v1673_v27  ;;  %1603 = vmatmul.mubr.msk.bf16.gmra.mxu1 %vm519_vm2, %v1689_v28 }
  0x51   : > { %1574 = vmatprep.mubr.msk.bf16.mxu0 %vm519_vm2, %v1674_v29  ;;  %1606 = vmatprep.mubr.msk.bf16.mxu1 %vm519_vm2, %v1690_v30 }
  0x58   : > { %1575 = vmatmul.mubr.msk.bf16.gmra.mxu0 %vm519_vm2, %v1675_v31  ;;  %1607 = vmatmul.mubr.msk.bf16.gmra.mxu1 %vm519_vm2, %v1691_v32 }
  0x59   : > { %1578 = vmatprep.mubr.msk.bf16.mxu0 %vm519_vm2, %v1676_v33  ;;  %1610 = vmatprep.mubr.msk.bf16.mxu1 %vm519_vm2, %v1692_v34 }
  0x60   : > { %1579 = vmatmul.mubr.msk.bf16.gmra.mxu0 %vm519_vm2, %v1677_v35  ;;  %1611 = vmatmul.mubr.msk.bf16.gmra.mxu1 %vm519_vm2, %v1693_v36 }
  0x61   : > { %1582 = vmatprep.mubr.msk.bf16.mxu0 %vm519_vm2, %v1678_v37  ;;  %1614 = vmatprep.mubr.msk.bf16.mxu1 %vm519_vm2, %v1694_v38 }
  0x68   : > { %1583 = vmatmul.mubr.msk.bf16.gmra.mxu0 %vm519_vm2, %v1679_v39  ;;  %1615 = vmatmul.mubr.msk.bf16.gmra.mxu1 %vm519_vm2, %v1695_v40 }
  0xf0   : > { %v1556_v42 = vpop.f32.mrf.mxu0  ;;  %v1588_v43 = vpop.f32.mrf.mxu1 }
  0xf1   : > { %v663_v44 = vadd.f32 %v1556_v42, %v1903_v41  ;;  %v1907_v45 = vadd.f32 %v1588_v43, %v1903_v41 }
  0xf2   : > { %v654_v46 = vpop.f32.mrf.mxu0  ;;  %v782_v47 = vpop.f32.mrf.mxu1 }
  0xf3   : > { %912 = vst.msk [vmem:[%s1812_s28 + $0x10] sm:$0xff] %vm909_vm3, %v663_v44  ;;  %v655_v48 = vadd.f32 %v1903_v41, %v654_v46  ;;  %944 = vst.msk [vmem:[%s1812_s28 + $0x110] sm:$0xff] %vm909_vm3, %v1907_v45  ;;  %v1916_v50 = vadd.f32 %v1903_v41, %v782_v47  ;;  %v1114_v58 = vmul.f32 %v663_v44, %v663_v44  ;;  %v978_v2 = vsel %vm909_vm3, %v663_v44, 0.0 }
  0xf4   : > { %v1557_v49 = vpop.f32.mrf.mxu0  ;;  %v1589_v51 = vpop.f32.mrf.mxu1 }
  0xf5   : > { %910 = vst.msk [vmem:[%s1812_s28] sm:$0xff] %vm909_vm3, %v655_v48  ;;  %v666_v52 = vadd.f32 %v1557_v49, %v1903_v41  ;;  %942 = vst.msk [vmem:[%s1812_s28 + $0x100] sm:$0xff] %vm909_vm3, %v1916_v50  ;;  %v1925_v54 = vadd.f32 %v1589_v51, %v1903_v41  ;;  %v1112_v56 = vmul.f32 %v655_v48, %v655_v48  ;;  %v975_v62 = vsel %vm909_vm3, %v655_v48, 0.0 }
  0xf6   : > { %v657_v53 = vpop.f32.mrf.mxu0  ;;  %v785_v55 = vpop.f32.mrf.mxu1  ;;  %v1179_v15 = vsel %vm909_vm3, %v1114_v58, 0.0 }
  0xf7   : > { %913 = vst.msk [vmem:[%s1812_s28 + $0x18] sm:$0xff] %vm909_vm3, %v666_v52  ;;  %v658_v57 = vadd.f32 %v1903_v41, %v657_v53  ;;  %945 = vst.msk [vmem:[%s1812_s28 + $0x118] sm:$0xff] %vm909_vm3, %v1925_v54  ;;  %v1934_v60 = vadd.f32 %v1903_v41, %v785_v55  ;;  %v1176_v6 = vsel %vm909_vm3, %v1112_v56, 0.0  ;;  %v1115_v7 = vmul.f32 %v666_v52, %v666_v52 }
  0xf8   : > { %v1560_v59 = vpop.f32.mrf.mxu0  ;;  %v1592_v61 = vpop.f32.mrf.mxu1  ;;  %v980_v16 = vsel %vm909_vm3, %v666_v52, 0.0 }
  0xf9   : > { %911 = vst.msk [vmem:[%s1812_s28 + $0x8] sm:$0xff] %vm909_vm3, %v658_v57  ;;  %v976_v63 = vsel %vm909_vm3, %v658_v57, 0.0  ;;  %v1113_v0 = vmul.f32 %v658_v57, %v658_v57  ;;  %v679_v1 = vadd.f32 %v1560_v59, %v1903_v41  ;;  %943 = vst.msk [vmem:[%s1812_s28 + $0x108] sm:$0xff] %vm909_vm3, %v1934_v60  ;;  %v1951_v13 = vadd.f32 %v1592_v61, %v1903_v41 }
  0xfa   : > { %v977_v3 = vadd.f32 %v976_v63, %v975_v62  ;;  %v670_v4 = vpop.f32.mrf.mxu0  ;;  %v798_v5 = vpop.f32.mrf.mxu1  ;;  %v1181_v23 = vsel %vm909_vm3, %v1115_v7, 0.0 }
  0xfb   : > { %v1177_v8 = vsel %vm909_vm3, %v1113_v0, 0.0  ;;  %916 = vst.msk [vmem:[%s1812_s28 + $0x30] sm:$0xff] %vm909_vm3, %v679_v1  ;;  %v671_v9 = vadd.f32 %v1903_v41, %v670_v4  ;;  %948 = vst.msk [vmem:[%s1812_s28 + $0x130] sm:$0xff] %vm909_vm3, %v1951_v13  ;;  %v1118_v26 = vmul.f32 %v679_v1, %v679_v1  ;;  %v1967_v30 = vadd.f32 %v1903_v41, %v798_v5 }
  0xfc   : > { %v979_v10 = vadd.f32 %v978_v2, %v977_v3  ;;  %v1178_v11 = vadd.f32 %v1177_v8, %v1176_v6  ;;  %v1561_v12 = vpop.f32.mrf.mxu0  ;;  %v1593_v14 = vpop.f32.mrf.mxu1  ;;  %v986_v40 = vsel %vm909_vm3, %v679_v1, 0.0 }
  0xfd   : > { %914 = vst.msk [vmem:[%s1812_s28 + $0x20] sm:$0xff] %vm909_vm3, %v671_v9  ;;  %v1116_v17 = vmul.f32 %v671_v9, %v671_v9  ;;  %v682_v18 = vadd.f32 %v1561_v12, %v1903_v41  ;;  %v982_v24 = vsel %vm909_vm3, %v671_v9, 0.0  ;;  %946 = vst.msk [vmem:[%s1812_s28 + $0x120] sm:$0xff] %vm909_vm3, %v1967_v30  ;;  %v1985_v49 = vadd.f32 %v1593_v14, %v1903_v41 }
  0xfe   : > { %v1180_v19 = vadd.f32 %v1179_v15, %v1178_v11  ;;  %v981_v20 = vadd.f32 %v980_v16, %v979_v10  ;;  %v673_v21 = vpop.f32.mrf.mxu0  ;;  %v801_v22 = vpop.f32.mrf.mxu1  ;;  %v1187_v52 = vsel %vm909_vm3, %v1118_v26, 0.0 }
  0xff   : > { %917 = vst.msk [vmem:[%s1812_s28 + $0x38] sm:$0xff] %vm909_vm3, %v682_v18  ;;  %v674_v25 = vadd.f32 %v1903_v41, %v673_v21  ;;  %v1183_v32 = vsel %vm909_vm3, %v1116_v17, 0.0  ;;  %v1119_v42 = vmul.f32 %v682_v18, %v682_v18  ;;  %v988_v53 = vsel %vm909_vm3, %v682_v18, 0.0  ;;  %949 = vst.msk [vmem:[%s1812_s28 + $0x138] sm:$0xff] %vm909_vm3, %v1985_v49 }
 0x100   : > { %v983_v27 = vadd.f32 %v982_v24, %v981_v20  ;;  %v1182_v28 = vadd.f32 %v1181_v23, %v1180_v19  ;;  %v1564_v29 = vpop.f32.mrf.mxu0  ;;  %v1596_v31 = vpop.f32.mrf.mxu1  ;;  %v2005_v5 = vadd.f32 %v1903_v41, %v801_v22 }
 0x101   : > { %915 = vst.msk [vmem:[%s1812_s28 + $0x28] sm:$0xff] %vm909_vm3, %v674_v25  ;;  %v984_v33 = vsel %vm909_vm3, %v674_v25, 0.0  ;;  %v1117_v34 = vmul.f32 %v674_v25, %v674_v25  ;;  %v695_v35 = vadd.f32 %v1564_v29, %v1903_v41  ;;  %v1189_v62 = vsel %vm909_vm3, %v1119_v42, 0.0 }
 0x102   : > { %v1184_v36 = vadd.f32 %v1183_v32, %v1182_v28  ;;  %v985_v37 = vadd.f32 %v984_v33, %v983_v27  ;;  %v686_v38 = vpop.f32.mrf.mxu0  ;;  %v1977_v39 = vpop.f32.mrf.mxu1  ;;  %947 = vst.msk [vmem:[%s1812_s28 + $0x128] sm:$0xff] %vm909_vm3, %v2005_v5  ;;  %v2025_v23 = vadd.f32 %v1596_v31, %v1903_v41 }
 0x103   : > { %v1185_v43 = vsel %vm909_vm3, %v1117_v34, 0.0  ;;  %920 = vst.msk [vmem:[%s1812_s28 + $0x50] sm:$0xff] %vm909_vm3, %v695_v35  ;;  %v687_v44 = vadd.f32 %v1903_v41, %v686_v38  ;;  %v1122_v1 = vmul.f32 %v695_v35, %v695_v35  ;;  %v994_v16 = vsel %vm909_vm3, %v695_v35, 0.0 }
 0x104   : > { %v987_v46 = vadd.f32 %v986_v40, %v985_v37  ;;  %v1186_v47 = vadd.f32 %v1185_v43, %v1184_v36  ;;  %v1565_v48 = vpop.f32.mrf.mxu0  ;;  %v1987_v51 = vpop.f32.mrf.mxu1  ;;  %952 = vst.msk [vmem:[%s1812_s28 + $0x150] sm:$0xff] %vm909_vm3, %v2025_v23  ;;  %v2046_v43 = vadd.f32 %v1903_v41, %v1977_v39 }
 0x105   : > { %918 = vst.msk [vmem:[%s1812_s28 + $0x40] sm:$0xff] %vm909_vm3, %v687_v44  ;;  %v1120_v55 = vmul.f32 %v687_v44, %v687_v44  ;;  %v698_v56 = vadd.f32 %v1565_v48, %v1903_v41  ;;  %v990_v63 = vsel %vm909_vm3, %v687_v44, 0.0  ;;  %v1195_v25 = vsel %vm909_vm3, %v1122_v1, 0.0 }
 0x106   : > { %v1188_v57 = vadd.f32 %v1187_v52, %v1186_v47  ;;  %v989_v58 = vadd.f32 %v988_v53, %v987_v46  ;;  %v689_v59 = vpop.f32.mrf.mxu0  ;;  %v1997_v61 = vpop.f32.mrf.mxu1  ;;  %950 = vst.msk [vmem:[%s1812_s28 + $0x140] sm:$0xff] %vm909_vm3, %v2046_v43 }
 0x107   : > { %921 = vst.msk [vmem:[%s1812_s28 + $0x58] sm:$0xff] %vm909_vm3, %v698_v56  ;;  %v690_v0 = vadd.f32 %v1903_v41, %v689_v59  ;;  %v1191_v7 = vsel %vm909_vm3, %v1120_v55, 0.0  ;;  %v1123_v17 = vmul.f32 %v698_v56, %v698_v56  ;;  %v996_v26 = vsel %vm909_vm3, %v698_v56, 0.0 }
 0x108   : > { %v991_v2 = vadd.f32 %v990_v63, %v989_v58  ;;  %v1190_v3 = vadd.f32 %v1189_v62, %v1188_v57  ;;  %v1568_v4 = vpop.f32.mrf.mxu0  ;;  %v2007_v6 = vpop.f32.mrf.mxu1 }
 0x109   : > { %919 = vst.msk [vmem:[%s1812_s28 + $0x48] sm:$0xff] %vm909_vm3, %v690_v0  ;;  %v992_v8 = vsel %vm909_vm3, %v690_v0, 0.0  ;;  %v1121_v9 = vmul.f32 %v690_v0, %v690_v0  ;;  %v711_v10 = vadd.f32 %v1568_v4, %v1903_v41  ;;  %v1197_v34 = vsel %vm909_vm3, %v1123_v17, 0.0 }
 0x10a   : > { %v1192_v11 = vadd.f32 %v1191_v7, %v1190_v3  ;;  %v993_v12 = vadd.f32 %v992_v8, %v991_v2  ;;  %v702_v14 = vpop.f32.mrf.mxu0  ;;  %v2017_v15 = vpop.f32.mrf.mxu1  ;;  %v2067_v2 = vadd.f32 %v1987_v51, %v1903_v41 }
 0x10b   : > { %v1193_v18 = vsel %vm909_vm3, %v1121_v9, 0.0  ;;  %924 = vst.msk [vmem:[%s1812_s28 + $0x70] sm:$0xff] %vm909_vm3, %v711_v10  ;;  %v703_v19 = vadd.f32 %v1903_v41, %v702_v14  ;;  %v1126_v37 = vmul.f32 %v711_v10, %v711_v10  ;;  %v1002_v57 = vsel %vm909_vm3, %v711_v10, 0.0 }
 0x10c   : > { %v995_v20 = vadd.f32 %v994_v16, %v993_v12  ;;  %v1194_v21 = vadd.f32 %v1193_v18, %v1192_v11  ;;  %v1569_v22 = vpop.f32.mrf.mxu0  ;;  %v2027_v24 = vpop.f32.mrf.mxu1  ;;  %953 = vst.msk [vmem:[%s1812_s28 + $0x158] sm:$0xff] %vm909_vm3, %v2067_v2 }
 0x10d   : > { %922 = vst.msk [vmem:[%s1812_s28 + $0x60] sm:$0xff] %vm909_vm3, %v703_v19  ;;  %v1124_v27 = vmul.f32 %v703_v19, %v703_v19  ;;  %v714_v28 = vadd.f32 %v1569_v22, %v1903_v41  ;;  %v998_v35 = vsel %vm909_vm3, %v703_v19, 0.0  ;;  %v1203_v4 = vsel %vm909_vm3, %v1126_v37, 0.0 }
 0x10e   : > { %v1196_v29 = vadd.f32 %v1195_v25, %v1194_v21  ;;  %v997_v32 = vadd.f32 %v996_v26, %v995_v20  ;;  %v705_v33 = vpop.f32.mrf.mxu0  ;;  %v2037_v31 = vpop.f32.mrf.mxu1  ;;  %v2088_v22 = vadd.f32 %v1903_v41, %v1997_v61 }
 0x10f   : > { %925 = vst.msk [vmem:[%s1812_s28 + $0x78] sm:$0xff] %vm909_vm3, %v714_v28  ;;  %v706_v36 = vadd.f32 %v1903_v41, %v705_v33  ;;  %v1199_v46 = vsel %vm909_vm3, %v1124_v27, 0.0  ;;  %v1127_v58 = vmul.f32 %v714_v28, %v714_v28  ;;  %v1004_v7 = vsel %vm909_vm3, %v714_v28, 0.0 }
 0x110   : > { %v999_v38 = vadd.f32 %v998_v35, %v997_v32  ;;  %v1198_v40 = vadd.f32 %v1197_v34, %v1196_v29  ;;  %v1572_v42 = vpop.f32.mrf.mxu0  ;;  %v2048_v44 = vpop.f32.mrf.mxu1  ;;  %951 = vst.msk [vmem:[%s1812_s28 + $0x148] sm:$0xff] %vm909_vm3, %v2088_v22 }
 0x111   : > { %923 = vst.msk [vmem:[%s1812_s28 + $0x68] sm:$0xff] %vm909_vm3, %v706_v36  ;;  %v1000_v47 = vsel %vm909_vm3, %v706_v36, 0.0  ;;  %v1125_v48 = vmul.f32 %v706_v36, %v706_v36  ;;  %v727_v52 = vadd.f32 %v1572_v42, %v1903_v41  ;;  %v1205_v14 = vsel %vm909_vm3, %v1127_v58, 0.0 }
 0x112   : > { %v1200_v53 = vadd.f32 %v1199_v46, %v1198_v40  ;;  %v1001_v55 = vadd.f32 %v1000_v47, %v999_v38  ;;  %v718_v56 = vpop.f32.mrf.mxu0  ;;  %v2058_v39 = vpop.f32.mrf.mxu1  ;;  %v2109_v47 = vadd.f32 %v2007_v6, %v1903_v41 }
 0x113   : > { %v1201_v59 = vsel %vm909_vm3, %v1125_v48, 0.0  ;;  %928 = vst.msk [vmem:[%s1812_s28 + $0x90] sm:$0xff] %vm909_vm3, %v727_v52  ;;  %v719_v62 = vadd.f32 %v1903_v41, %v718_v56  ;;  %v1130_v18 = vmul.f32 %v727_v52, %v727_v52  ;;  %v1010_v35 = vsel %vm909_vm3, %v727_v52, 0.0 }
 0x114   : > { %v1003_v63 = vadd.f32 %v1002_v57, %v1001_v55  ;;  %v1202_v0 = vadd.f32 %v1201_v59, %v1200_v53  ;;  %v1573_v1 = vpop.f32.mrf.mxu0  ;;  %v2069_v3 = vpop.f32.mrf.mxu1  ;;  %956 = vst.msk [vmem:[%s1812_s28 + $0x170] sm:$0xff] %vm909_vm3, %v2109_v47 }
 0x115   : > { %926 = vst.msk [vmem:[%s1812_s28 + $0x80] sm:$0xff] %vm909_vm3, %v719_v62  ;;  %v1128_v8 = vmul.f32 %v719_v62, %v719_v62  ;;  %v730_v9 = vadd.f32 %v1573_v1, %v1903_v41  ;;  %v1006_v16 = vsel %vm909_vm3, %v719_v62, 0.0  ;;  %v1211_v52 = vsel %vm909_vm3, %v1130_v18, 0.0 }
 0x116   : > { %v1204_v10 = vadd.f32 %v1203_v4, %v1202_v0  ;;  %v1005_v11 = vadd.f32 %v1004_v7, %v1003_v63  ;;  %v721_v12 = vpop.f32.mrf.mxu0  ;;  %v2079_v51 = vpop.f32.mrf.mxu1 }
 0x117   : > { %929 = vst.msk [vmem:[%s1812_s28 + $0x98] sm:$0xff] %vm909_vm3, %v730_v9  ;;  %v722_v17 = vadd.f32 %v1903_v41, %v721_v12  ;;  %v1207_v26 = vsel %vm909_vm3, %v1128_v8, 0.0  ;;  %v1131_v36 = vmul.f32 %v730_v9, %v730_v9  ;;  %v1012_v53 = vsel %vm909_vm3, %v730_v9, 0.0 }
 0x118   : > { %v1007_v19 = vadd.f32 %v1006_v16, %v1005_v11  ;;  %v1206_v20 = vadd.f32 %v1205_v14, %v1204_v10  ;;  %v1576_v21 = vpop.f32.mrf.mxu0  ;;  %v2090_v25 = vpop.f32.mrf.mxu1  ;;  %v2128_v8 = vadd.f32 %v1903_v41, %v2017_v15 }
 0x119   : > { %927 = vst.msk [vmem:[%s1812_s28 + $0x88] sm:$0xff] %vm909_vm3, %v722_v17  ;;  %v1008_v27 = vsel %vm909_vm3, %v722_v17, 0.0  ;;  %v1129_v28 = vmul.f32 %v722_v17, %v722_v17  ;;  %v743_v29 = vadd.f32 %v1576_v21, %v1903_v41  ;;  %v1213_v6 = vsel %vm909_vm3, %v1131_v36, 0.0 }
 0x11a   : > { %v1208_v32 = vadd.f32 %v1207_v26, %v1206_v20  ;;  %v1009_v33 = vadd.f32 %v1008_v27, %v1007_v19  ;;  %v734_v34 = vpop.f32.mrf.mxu0  ;;  %v2100_v61 = vpop.f32.mrf.mxu1  ;;  %954 = vst.msk [vmem:[%s1812_s28 + $0x160] sm:$0xff] %vm909_vm3, %v2128_v8 }
 0x11b   : > { %v1209_v37 = vsel %vm909_vm3, %v1129_v28, 0.0  ;;  %932 = vst.msk [vmem:[%s1812_s28 + $0xb0] sm:$0xff] %vm909_vm3, %v743_v29  ;;  %v735_v38 = vadd.f32 %v1903_v41, %v734_v34  ;;  %v1134_v0 = vmul.f32 %v743_v29, %v743_v29  ;;  %v1018_v15 = vsel %vm909_vm3, %v743_v29, 0.0 }
 0x11c   : > { %v1011_v40 = vadd.f32 %v1010_v35, %v1009_v33  ;;  %v1210_v42 = vadd.f32 %v1209_v37, %v1208_v32  ;;  %v1577_v46 = vpop.f32.mrf.mxu0  ;;  %v2111_v48 = vpop.f32.mrf.mxu1  ;;  %v2147_v32 = vadd.f32 %v2027_v24, %v1903_v41 }
 0x11d   : > { %930 = vst.msk [vmem:[%s1812_s28 + $0xa0] sm:$0xff] %vm909_vm3, %v735_v38  ;;  %v1132_v55 = vmul.f32 %v735_v38, %v735_v38  ;;  %v746_v56 = vadd.f32 %v1577_v46, %v1903_v41  ;;  %v1014_v62 = vsel %vm909_vm3, %v735_v38, 0.0  ;;  %v1219_v29 = vsel %vm909_vm3, %v1134_v0, 0.0 }
 0x11e   : > { %v1212_v57 = vadd.f32 %v1211_v52, %v1210_v42  ;;  %v1013_v58 = vadd.f32 %v1012_v53, %v1011_v40  ;;  %v737_v59 = vpop.f32.mrf.mxu0  ;;  %v2130_v9 = vpop.f32.mrf.mxu1  ;;  %957 = vst.msk [vmem:[%s1812_s28 + $0x178] sm:$0xff] %vm909_vm3, %v2147_v32 }
 0x11f   : > { %933 = vst.msk [vmem:[%s1812_s28 + $0xb8] sm:$0xff] %vm909_vm3, %v746_v56  ;;  %v738_v63 = vadd.f32 %v1903_v41, %v737_v59  ;;  %v1215_v10 = vsel %vm909_vm3, %v1132_v55, 0.0  ;;  %v1135_v19 = vmul.f32 %v746_v56, %v746_v56  ;;  %v1020_v34 = vsel %vm909_vm3, %v746_v56, 0.0 }
 0x120   : > { %v1015_v1 = vadd.f32 %v1014_v62, %v1013_v58  ;;  %v1214_v4 = vadd.f32 %v1213_v6, %v1212_v57  ;;  %v1580_v7 = vpop.f32.mrf.mxu0  ;;  %v2149_v33 = vpop.f32.mrf.mxu1  ;;  %v2166_v57 = vadd.f32 %v1903_v41, %v2037_v31 }
 0x121   : > { %931 = vst.msk [vmem:[%s1812_s28 + $0xa8] sm:$0xff] %vm909_vm3, %v738_v63  ;;  %v1016_v11 = vsel %vm909_vm3, %v738_v63, 0.0  ;;  %v1133_v12 = vmul.f32 %v738_v63, %v738_v63  ;;  %v759_v14 = vadd.f32 %v1580_v7, %v1903_v41  ;;  %v1221_v24 = vsel %vm909_vm3, %v1135_v19, 0.0 }
 0x122   : > { %v1216_v16 = vadd.f32 %v1215_v10, %v1214_v4  ;;  %v1017_v17 = vadd.f32 %v1016_v11, %v1015_v1  ;;  %v750_v18 = vpop.f32.mrf.mxu0  ;;  %v2168_v58 = vpop.f32.mrf.mxu1  ;;  %955 = vst.msk [vmem:[%s1812_s28 + $0x168] sm:$0xff] %vm909_vm3, %v2166_v57 }
 0x123   : > { %v1217_v20 = vsel %vm909_vm3, %v1133_v12, 0.0  ;;  %936 = vst.msk [vmem:[%s1812_s28 + $0xd0] sm:$0xff] %vm909_vm3, %v759_v14  ;;  %v751_v21 = vadd.f32 %v1903_v41, %v750_v18  ;;  %v1138_v52 = vmul.f32 %v759_v14, %v759_v14  ;;  %v1026_v31 = vsel %vm909_vm3, %v759_v14, 0.0 }
 0x124   : > { %v1019_v26 = vadd.f32 %v1018_v15, %v1017_v17  ;;  %v1218_v27 = vadd.f32 %v1217_v20, %v1216_v16  ;;  %v1581_v28 = vpop.f32.mrf.mxu0  ;;  %v2185_v18 = vadd.f32 %v2048_v44, %v1903_v41  ;;  %v2187_v15 = vpop.f32.mrf.mxu1 }
 0x125   : > { %934 = vst.msk [vmem:[%s1812_s28 + $0xc0] sm:$0xff] %vm909_vm3, %v751_v21  ;;  %v1136_v35 = vmul.f32 %v751_v21, %v751_v21  ;;  %v762_v36 = vadd.f32 %v1581_v28, %v1903_v41  ;;  %v1022_v42 = vsel %vm909_vm3, %v751_v21, 0.0  ;;  %v1227_v14 = vsel %vm909_vm3, %v1138_v52, 0.0 }
 0x126   : > { %v1220_v37 = vadd.f32 %v1219_v29, %v1218_v27  ;;  %v1021_v38 = vadd.f32 %v1020_v34, %v1019_v26  ;;  %v753_v40 = vpop.f32.mrf.mxu0  ;;  %960 = vst.msk [vmem:[%s1812_s28 + $0x190] sm:$0xff] %vm909_vm3, %v2185_v18  ;;  %v2212_v52 = vadd.f32 %v2069_v3, %v1903_v41 }
 0x127   : > { %937 = vst.msk [vmem:[%s1812_s28 + $0xd8] sm:$0xff] %vm909_vm3, %v762_v36  ;;  %v754_v46 = vadd.f32 %v1903_v41, %v753_v40  ;;  %v1223_v59 = vsel %vm909_vm3, %v1136_v35, 0.0  ;;  %v1139_v7 = vmul.f32 %v762_v36, %v762_v36  ;;  %v1028_v19 = vsel %vm909_vm3, %v762_v36, 0.0  ;;  %v881_v40 = vpop.f32.mrf.mxu1 }
 0x128   : > { %v1023_v53 = vadd.f32 %v1022_v42, %v1021_v38  ;;  %v1222_v55 = vadd.f32 %v1221_v24, %v1220_v37  ;;  %v1584_v56 = vpop.f32.mrf.mxu0  ;;  %v2204_v38 = vadd.f32 %v1903_v41, %v2058_v39  ;;  %961 = vst.msk [vmem:[%s1812_s28 + $0x198] sm:$0xff] %vm909_vm3, %v2212_v52 }
 0x129   : > { %935 = vst.msk [vmem:[%s1812_s28 + $0xc8] sm:$0xff] %vm909_vm3, %v754_v46  ;;  %v1024_v6 = vsel %vm909_vm3, %v754_v46, 0.0  ;;  %v1137_v62 = vmul.f32 %v754_v46, %v754_v46  ;;  %v775_v63 = vadd.f32 %v1584_v56, %v1903_v41  ;;  %v1229_v44 = vsel %vm909_vm3, %v1139_v7, 0.0 }
 0x12a   : > { %v1224_v0 = vadd.f32 %v1223_v59, %v1222_v55  ;;  %v1025_v1 = vadd.f32 %v1024_v6, %v1023_v53  ;;  %v766_v4 = vpop.f32.mrf.mxu0  ;;  %958 = vst.msk [vmem:[%s1812_s28 + $0x180] sm:$0xff] %vm909_vm3, %v2204_v38  ;;  %v2224_v6 = vadd.f32 %v1903_v41, %v2079_v51  ;;  %v2239_v51 = vadd.f32 %v1903_v41, %v2100_v61 }
 0x12b   : > { %v1225_v10 = vsel %vm909_vm3, %v1137_v62, 0.0  ;;  %940 = vst.msk [vmem:[%s1812_s28 + $0xf0] sm:$0xff] %vm909_vm3, %v775_v63  ;;  %v767_v11 = vadd.f32 %v1903_v41, %v766_v4  ;;  %v1142_v35 = vmul.f32 %v775_v63, %v775_v63  ;;  %v1034_v39 = vsel %vm909_vm3, %v775_v63, 0.0 }
 0x12c   : > { %v1027_v12 = vadd.f32 %v1026_v31, %v1025_v1  ;;  %v1226_v16 = vadd.f32 %v1225_v10, %v1224_v0  ;;  %v1585_v17 = vpop.f32.mrf.mxu0  ;;  %v2228_v0 = vadd.f32 %v2090_v25, %v1903_v41  ;;  %v1616_v1 = vpop.f32.mrf.mxu1  ;;  %v1144_v31 = vmul.f32 %v1916_v50, %v1916_v50  ;;  %959 = vst.msk [vmem:[%s1812_s28 + $0x188] sm:$0xff] %vm909_vm3, %v2224_v6 }
 0x12d   : > { %938 = vst.msk [vmem:[%s1812_s28 + $0xe0] sm:$0xff] %vm909_vm3, %v767_v11  ;;  %v1140_v20 = vmul.f32 %v767_v11, %v767_v11  ;;  %v778_v21 = vadd.f32 %v1585_v17, %v1903_v41  ;;  %v1030_v29 = vsel %vm909_vm3, %v767_v11, 0.0  ;;  %v1235_v63 = vsel %vm909_vm3, %v1142_v35, 0.0  ;;  %962 = vst.msk [vmem:[%s1812_s28 + $0x1a0] sm:$0xff] %vm909_vm3, %v2239_v51 }
 0x12e   : > { %v1228_v26 = vadd.f32 %v1227_v14, %v1226_v16  ;;  %v1029_v27 = vadd.f32 %v1028_v19, %v1027_v12  ;;  %v769_v28 = vpop.f32.mrf.mxu0  ;;  %964 = vst.msk [vmem:[%s1812_s28 + $0x1b0] sm:$0xff] %vm909_vm3, %v2228_v0  ;;  %v1038_v11 = vsel %vm909_vm3, %v1916_v50, 0.0  ;;  %v1145_v12 = vmul.f32 %v1934_v60, %v1934_v60  ;;  %v894_v19 = vpop.f32.mrf.mxu1 }
 0x12f   : > { %941 = vst.msk [vmem:[%s1812_s28 + $0xf8] sm:$0xff] %vm909_vm3, %v778_v21  ;;  %v770_v34 = vadd.f32 %v1903_v41, %v769_v28  ;;  %v1231_v24 = vsel %vm909_vm3, %v1140_v20, 0.0  ;;  %v1143_v56 = vmul.f32 %v778_v21, %v778_v21  ;;  %v1036_v4 = vsel %vm909_vm3, %v778_v21, 0.0 }
 0x130   : > { %v1031_v36 = vadd.f32 %v1030_v29, %v1029_v27  ;;  %v1230_v37 = vadd.f32 %v1229_v44, %v1228_v26  ;;  %v2254_v61 = vadd.f32 %v2111_v48, %v1903_v41  ;;  %v2258_v14 = vadd.f32 %v1903_v41, %v2130_v9 }
 0x131   : > { %939 = vst.msk [vmem:[%s1812_s28 + $0xe8] sm:$0xff] %vm909_vm3, %v770_v34  ;;  %v1032_v42 = vsel %vm909_vm3, %v770_v34, 0.0  ;;  %v1141_v46 = vmul.f32 %v770_v34, %v770_v34  ;;  %v1237_v25 = vsel %vm909_vm3, %v1143_v56, 0.0  ;;  %v1146_v50 = vmul.f32 %v1907_v45, %v1907_v45 }
 0x132   : > { %v1232_v53 = vadd.f32 %v1231_v24, %v1230_v37  ;;  %v1033_v55 = vadd.f32 %v1032_v42, %v1031_v36  ;;  %v1239_v20 = vsel %vm909_vm3, %v1144_v31, 0.0  ;;  %v1040_v21 = vsel %vm909_vm3, %v1934_v60, 0.0  ;;  %965 = vst.msk [vmem:[%s1812_s28 + $0x1b8] sm:$0xff] %vm909_vm3, %v2254_v61  ;;  %963 = vst.msk [vmem:[%s1812_s28 + $0x1a8] sm:$0xff] %vm909_vm3, %v2258_v14 }
 0x133   : > { %v1233_v59 = vsel %vm909_vm3, %v1141_v46, 0.0  ;;  %v2270_v48 = vadd.f32 %v2149_v33, %v1903_v41  ;;  %v1042_v27 = vsel %vm909_vm3, %v1907_v45, 0.0  ;;  %v1147_v60 = vmul.f32 %v1925_v54, %v1925_v54  ;;  %v1617_v45 = vpop.f32.mrf.mxu1 }
 0x134   : > { %v1035_v3 = vadd.f32 %v1034_v39, %v1033_v55  ;;  %v1234_v62 = vadd.f32 %v1233_v59, %v1232_v53  ;;  %v1241_v28 = vsel %vm909_vm3, %v1145_v12, 0.0  ;;  %v2285_v33 = vadd.f32 %v1903_v41, %v2168_v58 }
 0x135   : > { %968 = vst.msk [vmem:[%s1812_s28 + $0x1d0] sm:$0xff] %vm909_vm3, %v2270_v48  ;;  %v2289_v34 = vadd.f32 %v2187_v15, %v1903_v41  ;;  %v1243_v35 = vsel %vm909_vm3, %v1146_v50, 0.0  ;;  %v1044_v36 = vsel %vm909_vm3, %v1925_v54, 0.0  ;;  %v1148_v37 = vmul.f32 %v1967_v30, %v1967_v30  ;;  %v897_v56 = vpop.f32.mrf.mxu1 }
 0x136   : > { %v1236_v7 = vadd.f32 %v1235_v63, %v1234_v62  ;;  %v1037_v10 = vadd.f32 %v1036_v4, %v1035_v3  ;;  %966 = vst.msk [vmem:[%s1812_s28 + $0x1c0] sm:$0xff] %vm909_vm3, %v2285_v33  ;;  %v2300_v58 = vadd.f32 %v1903_v41, %v881_v40  ;;  %v1245_v15 = vsel %vm909_vm3, %v1147_v60, 0.0 }
 0x137   : > { %969 = vst.msk [vmem:[%s1812_s28 + $0x1d8] sm:$0xff] %vm909_vm3, %v2289_v34  ;;  %v1046_v54 = vsel %vm909_vm3, %v1967_v30, 0.0  ;;  %v1149_v46 = vmul.f32 %v2005_v5, %v2005_v5  ;;  %v2314_v40 = vadd.f32 %v1616_v1, %v1903_v41  ;;  %v2317_v39 = vadd.f32 %v1903_v41, %v894_v19 }
 0x138   : > { %v1039_v16 = vadd.f32 %v1038_v11, %v1037_v10  ;;  %v1238_v17 = vadd.f32 %v1237_v25, %v1236_v7  ;;  %967 = vst.msk [vmem:[%s1812_s28 + $0x1c8] sm:$0xff] %vm909_vm3, %v2300_v58  ;;  %v1150_v59 = vmul.f32 %v1951_v13, %v1951_v13  ;;  %v1247_v30 = vsel %vm909_vm3, %v1148_v37, 0.0 }
 0x139   : > { %v1048_v3 = vsel %vm909_vm3, %v2005_v5, 0.0  ;;  %972 = vst.msk [vmem:[%s1812_s28 + $0x1f0] sm:$0xff] %vm909_vm3, %v2314_v40  ;;  %v2328_v62 = vadd.f32 %v1617_v45, %v1903_v41  ;;  %970 = vst.msk [vmem:[%s1812_s28 + $0x1e0] sm:$0xff] %vm909_vm3, %v2317_v39  ;;  %v1050_v4 = vsel %vm909_vm3, %v1951_v13, 0.0  ;;  %v1151_v31 = vmul.f32 %v1985_v49, %v1985_v49 }
 0x13a   : > { %v1041_v26 = vadd.f32 %v1040_v21, %v1039_v16  ;;  %v1240_v9 = vadd.f32 %v1239_v20, %v1238_v17  ;;  %v1249_v5 = vsel %vm909_vm3, %v1149_v46, 0.0  ;;  %v2342_v7 = vadd.f32 %v1903_v41, %v897_v56 }
 0x13b   : > { %973 = vst.msk [vmem:[%s1812_s28 + $0x1f8] sm:$0xff] %vm909_vm3, %v2328_v62  ;;  %v1251_v11 = vsel %vm909_vm3, %v1150_v59, 0.0  ;;  %v1052_v12 = vsel %vm909_vm3, %v1985_v49, 0.0  ;;  %v1152_v13 = vmul.f32 %v2046_v43, %v2046_v43  ;;  %v1253_v19 = vsel %vm909_vm3, %v1151_v31, 0.0 }
 0x13c   : > { %v1043_v44 = vadd.f32 %v1042_v27, %v1041_v26  ;;  %v1242_v29 = vadd.f32 %v1241_v28, %v1240_v9  ;;  %971 = vst.msk [vmem:[%s1812_s28 + $0x1e8] sm:$0xff] %vm909_vm3, %v2342_v7  ;;  %v1054_v41 = vsel %vm909_vm3, %v2046_v43, 0.0  ;;  %v1153_v50 = vmul.f32 %v2088_v22, %v2088_v22 }
 0x13d   : > { %v1154_v49 = vmul.f32 %v2025_v23, %v2025_v23  ;;  %v1255_v26 = vsel %vm909_vm3, %v1152_v13, 0.0  ;;  %v1056_v9 = vsel %vm909_vm3, %v2088_v22, 0.0  ;;  %v1058_v28 = vsel %vm909_vm3, %v2025_v23, 0.0 }
 0x13e   : > { %v1244_v24 = vadd.f32 %v1243_v35, %v1242_v29  ;;  %v1045_v42 = vadd.f32 %v1044_v36, %v1043_v44  ;;  %v1155_v43 = vmul.f32 %v2067_v2, %v2067_v2  ;;  %v1257_v44 = vsel %vm909_vm3, %v1153_v50, 0.0 }
 0x13f   : > { %v1259_v35 = vsel %vm909_vm3, %v1154_v49, 0.0  ;;  %v1060_v36 = vsel %vm909_vm3, %v2067_v2, 0.0  ;;  %v1156_v22 = vmul.f32 %v2128_v8, %v2128_v8  ;;  %v1062_v23 = vsel %vm909_vm3, %v2128_v8, 0.0 }
 0x140   : > { %v1047_v53 = vadd.f32 %v1046_v54, %v1045_v42  ;;  %v1246_v55 = vadd.f32 %v1245_v15, %v1244_v24  ;;  %v1261_v42 = vsel %vm909_vm3, %v1155_v43, 0.0  ;;  %v1157_v15 = vmul.f32 %v2166_v57, %v2166_v57 }
 0x141   : > { %v1263_v2 = vsel %vm909_vm3, %v1156_v22, 0.0  ;;  %v1159_v8 = vmul.f32 %v2147_v32, %v2147_v32  ;;  %v1068_v31 = vsel %vm909_vm3, %v2147_v32, 0.0  ;;  %v1074_v50 = vsel %vm909_vm3, %v2185_v18, 0.0 }
 0x142   : > { %v1248_v1 = vadd.f32 %v1247_v30, %v1246_v55  ;;  %v1049_v63 = vadd.f32 %v1048_v3, %v1047_v53  ;;  %v1158_v53 = vmul.f32 %v2109_v47, %v2109_v47  ;;  %v1064_v55 = vsel %vm909_vm3, %v2166_v57, 0.0 }
 0x143   : > { %v1066_v30 = vsel %vm909_vm3, %v2109_v47, 0.0  ;;  %v1265_v3 = vsel %vm909_vm3, %v1157_v15, 0.0  ;;  %v1160_v57 = vmul.f32 %v2204_v38, %v2204_v38  ;;  %v1070_v47 = vsel %vm909_vm3, %v2204_v38, 0.0 }
 0x144   : > { %v1051_v10 = vadd.f32 %v1050_v4, %v1049_v63  ;;  %v1250_v25 = vadd.f32 %v1249_v5, %v1248_v1  ;;  %v1267_v4 = vsel %vm909_vm3, %v1158_v53, 0.0  ;;  %v1163_v38 = vmul.f32 %v2212_v52, %v2212_v52 }
 0x145   : > { %v1271_v32 = vsel %vm909_vm3, %v1160_v57, 0.0  ;;  %v1165_v43 = vmul.f32 %v2258_v14, %v2258_v14 }
 0x146   : > { %v1252_v16 = vadd.f32 %v1251_v11, %v1250_v25  ;;  %v1053_v17 = vadd.f32 %v1052_v12, %v1051_v10  ;;  %v1269_v25 = vsel %vm909_vm3, %v1159_v8, 0.0  ;;  %v1161_v11 = vmul.f32 %v2224_v6, %v2224_v6 }
 0x147   : > { %v1088_v8 = vsel %vm909_vm3, %v2300_v58, 0.0 }
 0x148   : > { %v1055_v20 = vadd.f32 %v1054_v41, %v1053_v17  ;;  %v1254_v21 = vadd.f32 %v1253_v19, %v1252_v16  ;;  %v1162_v16 = vmul.f32 %v2185_v18, %v2185_v18  ;;  %v1072_v17 = vsel %vm909_vm3, %v2224_v6, 0.0 }
 0x149   : > { %v1164_v6 = vmul.f32 %v2239_v51, %v2239_v51  ;;  %v1078_v18 = vsel %vm909_vm3, %v2239_v51, 0.0  ;;  %v1167_v51 = vmul.f32 %v2254_v61, %v2254_v61 }
 0x14a   : > { %v1256_v27 = vadd.f32 %v1255_v26, %v1254_v21  ;;  %v1057_v60 = vadd.f32 %v1056_v9, %v1055_v20  ;;  %v1273_v20 = vsel %vm909_vm3, %v1161_v11, 0.0  ;;  %v1275_v26 = vsel %vm909_vm3, %v1162_v16, 0.0 }
 0x14b   : > { %v1076_v9 = vsel %vm909_vm3, %v2212_v52, 0.0  ;;  %v1279_v52 = vsel %vm909_vm3, %v1164_v6, 0.0 }
 0x14c   : > { %v1059_v29 = vadd.f32 %v1058_v28, %v1057_v60  ;;  %v1258_v45 = vadd.f32 %v1257_v44, %v1256_v27  ;;  %v1277_v28 = vsel %vm909_vm3, %v1163_v38, 0.0 }
 0x14e   : > { %v1260_v37 = vadd.f32 %v1259_v35, %v1258_v45  ;;  %v1061_v24 = vadd.f32 %v1060_v36, %v1059_v29  ;;  %v1166_v45 = vmul.f32 %v2228_v0, %v2228_v0  ;;  %v1080_v35 = vsel %vm909_vm3, %v2258_v14, 0.0 }
 0x14f   : > { %v1168_v14 = vmul.f32 %v2285_v33, %v2285_v33 }
 0x150   : > { %v1063_v54 = vadd.f32 %v1062_v23, %v1061_v24  ;;  %v1262_v46 = vadd.f32 %v1261_v42, %v1260_v37  ;;  %v1082_v37 = vsel %vm909_vm3, %v2228_v0, 0.0  ;;  %v1281_v24 = vsel %vm909_vm3, %v1165_v43, 0.0 }
 0x151   : > { %v1283_v15 = vsel %vm909_vm3, %v1166_v45, 0.0  ;;  %v1086_v0 = vsel %vm909_vm3, %v2285_v33, 0.0  ;;  %v1171_v33 = vmul.f32 %v2289_v34, %v2289_v34 }
 0x152   : > { %v1264_v56 = vadd.f32 %v1263_v2, %v1262_v46  ;;  %v1065_v59 = vadd.f32 %v1064_v55, %v1063_v54  ;;  %v1084_v54 = vsel %vm909_vm3, %v2254_v61, 0.0  ;;  %v1285_v2 = vsel %vm909_vm3, %v1167_v51, 0.0 }
 0x153   : > { %v1169_v55 = vmul.f32 %v2300_v58, %v2300_v58  ;;  %v1287_v61 = vsel %vm909_vm3, %v1168_v14, 0.0  ;;  %v1172_v58 = vmul.f32 %v2317_v39, %v2317_v39  ;;  %v1293_v11 = vsel %vm909_vm3, %v1171_v33, 0.0 }
 0x154   : > { %v1067_v1 = vadd.f32 %v1066_v30, %v1065_v59  ;;  %v1266_v63 = vadd.f32 %v1265_v3, %v1264_v56  ;;  %v1170_v30 = vmul.f32 %v2270_v48, %v2270_v48 }
 0x156   : > { %v1268_v5 = vadd.f32 %v1267_v4, %v1266_v63  ;;  %v1069_v10 = vadd.f32 %v1068_v31, %v1067_v1  ;;  %v1090_v63 = vsel %vm909_vm3, %v2270_v48, 0.0  ;;  %v1289_v4 = vsel %vm909_vm3, %v1169_v55, 0.0 }
 0x157   : > { %v1094_v48 = vsel %vm909_vm3, %v2317_v39, 0.0  ;;  %v1175_v39 = vmul.f32 %v2328_v62, %v2328_v62 }
 0x158   : > { %v1071_v12 = vadd.f32 %v1070_v47, %v1069_v10  ;;  %v1270_v13 = vadd.f32 %v1269_v25, %v1268_v5  ;;  %v1291_v5 = vsel %vm909_vm3, %v1170_v30, 0.0  ;;  %v1092_v10 = vsel %vm909_vm3, %v2289_v34, 0.0 }
 0x159   : > { %v1295_v34 = vsel %vm909_vm3, %v1172_v58, 0.0 }
 0x15a   : > { %v1272_v19 = vadd.f32 %v1271_v32, %v1270_v13  ;;  %v1073_v41 = vadd.f32 %v1072_v17, %v1071_v12  ;;  %v1173_v12 = vmul.f32 %v2342_v7, %v2342_v7  ;;  %v1174_v32 = vmul.f32 %v2314_v40, %v2314_v40 }
 0x15b   : > { %v1096_v17 = vsel %vm909_vm3, %v2342_v7, 0.0  ;;  %v1301_v7 = vsel %vm909_vm3, %v1175_v39, 0.0 }
 0x15c   : > { %v1075_v21 = vadd.f32 %v1074_v50, %v1073_v41  ;;  %v1274_v49 = vadd.f32 %v1273_v20, %v1272_v19  ;;  %v1098_v50 = vsel %vm909_vm3, %v2314_v40, 0.0  ;;  %v1297_v38 = vsel %vm909_vm3, %v1173_v12, 0.0 }
 0x15e   : > { %v1276_v27 = vadd.f32 %v1275_v26, %v1274_v49  ;;  %v1077_v60 = vadd.f32 %v1076_v9, %v1075_v21  ;;  %v1299_v49 = vsel %vm909_vm3, %v1174_v32, 0.0  ;;  %v1100_v26 = vsel %vm909_vm3, %v2328_v62, 0.0 }
 0x160   : > { %v1079_v44 = vadd.f32 %v1078_v18, %v1077_v60  ;;  %v1278_v29 = vadd.f32 %v1277_v28, %v1276_v27 }
 0x162   : > { %v1280_v36 = vadd.f32 %v1279_v52, %v1278_v29  ;;  %v1081_v22 = vadd.f32 %v1080_v35, %v1079_v44  ;;  %v974_v35 = vld [vmem:[#allocation2] sm:$0x1] }
 0x164   : > { %v1083_v42 = vadd.f32 %v1082_v37, %v1081_v22  ;;  %v1282_v23 = vadd.f32 %v1281_v24, %v1280_v36  ;;  %v1111_v22 = vld [vmem:[#allocation4] sm:$0x1] }
 0x166   : > { %v1284_v46 = vadd.f32 %v1283_v15, %v1282_v23  ;;  %v1085_v53 = vadd.f32 %v1084_v54, %v1083_v42 }
 0x168   : > { %v1087_v56 = vadd.f32 %v1086_v0, %v1085_v53  ;;  %v1286_v59 = vadd.f32 %v1285_v2, %v1284_v46 }
 0x16a   : > { %v1288_v3 = vadd.f32 %v1287_v61, %v1286_v59  ;;  %v1089_v1 = vadd.f32 %v1088_v8, %v1087_v56 }
 0x16c   : > { %v1091_v31 = vadd.f32 %v1090_v63, %v1089_v1  ;;  %v1290_v57 = vadd.f32 %v1289_v4, %v1288_v3 }
 0x16e   : > { %v1292_v25 = vadd.f32 %v1291_v5, %v1290_v57  ;;  %v1093_v47 = vadd.f32 %v1092_v10, %v1091_v31 }
 0x170   : > { %v1095_v13 = vadd.f32 %v1094_v48, %v1093_v47  ;;  %v1294_v16 = vadd.f32 %v1293_v11, %v1292_v25 }
 0x172   : > { %v1296_v19 = vadd.f32 %v1295_v34, %v1294_v16  ;;  %v1097_v41 = vadd.f32 %v1096_v17, %v1095_v13 }
 0x174   : > { %v1099_v20 = vadd.f32 %v1098_v50, %v1097_v41  ;;  %v1298_v21 = vadd.f32 %v1297_v38, %v1296_v19 }
 0x176   : > { %v1101_v9 = vadd.f32 %v1100_v26, %v1099_v20  ;;  %v1300_v6 = vadd.f32 %v1299_v49, %v1298_v21 }
 0x178   : > { %v1102_v27 = vrot.slane %v1101_v9, 4  ;;  %v1302_v60 = vadd.f32 %v1301_v7, %v1300_v6 }
 0x17a   : > { %v1103_v40 = vadd.f32 %v1102_v27, %v1101_v9  ;;  %v1303_v28 = vrot.slane %v1302_v60, 4 }
 0x17c   : > { %v1104_v18 = vrot.slane %v1103_v40, 2  ;;  %v1304_v43 = vadd.f32 %v1303_v28, %v1302_v60 }
 0x17e   : > { %v1105_v44 = vadd.f32 %v1104_v18, %v1103_v40  ;;  %v1305_v29 = vrot.slane %v1304_v43, 2 }
 0x180   : > { %v1106_v45 = vrot.slane %v1105_v44, 1  ;;  %v1306_v52 = vadd.f32 %v1305_v29, %v1304_v43 }
 0x182   : > { %v1107_v62 = vadd.f32 %v1106_v45, %v1105_v44  ;;  %v1307_v36 = vrot.slane %v1306_v52, 1 }
 0x184   : > { %v1108_v37 = vadd.f32 %v1107_v62, %v974_v35  ;;  %v1308_v51 = vadd.f32 %v1307_v36, %v1306_v52 }
 0x186   : > { %1110 = vst.msk [vmem:[#allocation2] sm:$0x1] %vm1109_vm4, %v1108_v37  ;;  %v1309_v24 = vadd.f32 %v1308_v51, %v1111_v22 }
 0x187   : > { %1709 = shalt.err (!%p1706_p12)
}
 0x188   : > { %1635 = dma.vmem_to_hbm [thread:$0]  (%p1642_p5), %s1328_s23, 16, %s2503_s4, [#allocation3]   ;;  %1310 = vst.msk [vmem:[#allocation4] sm:$0x1] %vm1109_vm4, %v1309_v24 }
 0x189   : > { %s1720_s30 = scalar_lea.vmem %s1339_s25, 16  ;;  %s1726_s6 = scalar_lea.vmem %s1339_s25, 32 }
 0x18a   : > { %p1721_p13 = scmp.ne.s32.totalorder %s1339_s25, %s1720_s30  ;;  %p1727_p2 = scmp.lt.s32.totalorder %s1339_s25, %s1339_s25 }
 0x18b   : > { %p1728_p3 = scmp.lt.s32.totalorder %s1726_s6, %s1720_s30 }
 0x18c   : > { %p1722_p0 = pnand %p1721_p13, %p1642_p5 }
 0x18d   : > { %p1729_p4 = por %p1728_p3, %p1727_p2 }
 0x18e   : > { %p1723_p1 = pneg %p1722_p0 }
 0x190   : > { %p1730_p6 = pnand %p1729_p4, %p1723_p1 }
 0x192   : > { %1733 = shalt.err (!%p1730_p6)
}
 0x193   : > { %1637 = dma.vmem_to_hbm [thread:$0]  (%p1642_p5), %s1339_s25, 16, %s2504_s5, [#allocation5]  }
 0x194   : > { %1749 = dma.done.wait (%p1642_p5), [#allocation3], 16  }
 0x195   : > { %1751 = vsyncadd (%p1642_p5), [#allocation3], 4294967280 }
 0x196   : > { %1753 = dma.done.wait (%p1642_p5), [#allocation5], 16  }
 0x197   : > { %1755 = vsyncadd (%p1642_p5), [#allocation5], 4294967280 }
 0x198 PF: > { %s18_s18 = sadd.s32 1, %s1758_s18  }
 0x199   : > { %p15_p7 = scmp.ge.s32.totalorder %s18_s18, 4  }
 0x19b   :  { %17 = sbr.rel (!%p15_p7) target bundleno = 2 (0x2), region = 83 }
 0x1a0   :  { %1363 = vsyncpa [#allocation3], 1 }
 0x1a1   :  { %1365 = vsyncpa [#allocation3 + $0x1], 1 }
 0x1a2   :  { %1366 = vsyncpa [#allocation5], 1 }

</bundles_post_ra>
